<compile_context>
chip_gen: v7x
topology: tpu7x:2x2x1
jax: 0.10.0
libtpu: 0.0.40
codegen_flags: <defaults>
</compile_context>

<pallas_src>
import functools

import jax
import jax.numpy as jnp
from jax.experimental import pallas as pl
from jax.experimental.pallas import tpu as pltpu

HIDDEN = 128
LANE = 128


def simple_nn_kernel(x_ref, w1_ref, b1_ref, w2_ref, b2_ref, out_ref, act_ref):
    # fc1 + relu (MXU matmul, f32 accumulate).
    h = jnp.dot(x_ref[...], w1_ref[...], preferred_element_type=jnp.float32)
    h = jnp.maximum(h + b1_ref[...], 0.0)                 # (B, 128)

    # Global min-max normalization over the whole hidden-activation tensor.
    # Two independent keepdims reductions (can overlap on the XLUs), then a
    # scalar-shaped reciprocal and a single VPU multiply — no full-width divide.
    h_min = jnp.min(h, keepdims=True)                      # (1, 1)
    h_max = jnp.max(h, keepdims=True)                      # (1, 1)
    inv = pl.reciprocal(h_max - h_min, approx=False)       # exact: 1e-5 parity
    act_ref[...] = (h - h_min) * inv                       # NaN if range==0 (matches PyTorch)

    # fc2 intentionally consumes the UN-normalized h (matches the PyTorch module).
    out_ref[...] = (
        jnp.dot(h, w2_ref[...], preferred_element_type=jnp.float32) + b2_ref[...]
    )


def _round_up(n, m):
    return ((n + m - 1) // m) * m


def prepare_fc2_params(w2, b2):
    """Init-time (call-once) lane-padding of fc2 params to a multiple of 128.

    Hoisted out of the jitted forward so the zeros + dynamic_update_slice pairs
    are not re-issued (and re-read from HBM) on every forward call.
    """
    out_size = w2.shape[1]
    n_pad = _round_up(out_size, LANE)
    w2_p = jnp.zeros((w2.shape[0], n_pad), w2.dtype).at[:, :out_size].set(w2)
    b2_p = (
        jnp.zeros((1, n_pad), b2.dtype)
        .at[:, :out_size]
        .set(jnp.reshape(b2, (1, out_size)))
    )
    return w2_p, b2_p


@functools.partial(jax.jit, static_argnames=("out_size",))
def simple_nn_forward(x, w1, b1, w2_p, b2_p, *, out_size):
    """Returns (output, normalized_activations).

    output:      (B, out_size)   == fc2(relu(fc1(x)))
    activations: (1, B*128)      == minmax-normalized relu(fc1(x)), flattened,
                                    mirroring `self.activations` in the PyTorch module.
    """
    B, _ = x.shape
    n_pad = w2_p.shape[1]

    out_p, act_p = pl.pallas_call(
        simple_nn_kernel,
        out_shape=(
            jax.ShapeDtypeStruct((B, n_pad), jnp.float32),
            jax.ShapeDtypeStruct((B, HIDDEN), jnp.float32),
        ),
        # Tiny shapes: every operand is a single full-array block resident in
        # VMEM (full-array blocks need not be (8,128)-aligned), far under every
        # chip's scoped-VMEM limit, including v7x's 64 MiB physical VMEM.
        in_specs=[
            pl.BlockSpec(memory_space=pltpu.MemorySpace.VMEM),  # x    (B, in)
            pl.BlockSpec(memory_space=pltpu.MemorySpace.VMEM),  # w1   (in, 128)
            pl.BlockSpec(memory_space=pltpu.MemorySpace.VMEM),  # b1   (1, 128)
            pl.BlockSpec(memory_space=pltpu.MemorySpace.VMEM),  # w2_p (128, n_pad)
            pl.BlockSpec(memory_space=pltpu.MemorySpace.VMEM),  # b2_p (1, n_pad)
        ],
        out_specs=(
            pl.BlockSpec(memory_space=pltpu.MemorySpace.VMEM),
            pl.BlockSpec(memory_space=pltpu.MemorySpace.VMEM),
        ),
    )(x, w1, b1, w2_p, b2_p)

    # Strip fc2 lane-padding; PyTorch reshapes the activations to (1, -1).
    out = out_p[:, :out_size]
    act = act_p.reshape(1, -1)
    return out, act


if __name__ == "__main__":
    batch = 2
    input_size = 32
    output_size = 10

    key = jax.random.PRNGKey(0)
    kx, k1, k2, k3, k4 = jax.random.split(key, 5)

    # Deterministic synthetic parameters (PyTorch-Linear-like scale).
    x = jax.random.normal(kx, (batch, input_size), dtype=jnp.float32)
    w1 = jax.random.uniform(k1, (input_size, HIDDEN), jnp.float32,
                            minval=-1.0, maxval=1.0) / jnp.sqrt(input_size)
    b1 = jax.random.uniform(k2, (1, HIDDEN), jnp.float32,
                            minval=-1.0, maxval=1.0) / jnp.sqrt(input_size)
    w2 = jax.random.uniform(k3, (HIDDEN, output_size), jnp.float32,
                            minval=-1.0, maxval=1.0) / jnp.sqrt(HIDDEN)
    b2 = jax.random.uniform(k4, (1, output_size), jnp.float32,
                            minval=-1.0, maxval=1.0) / jnp.sqrt(HIDDEN)

    # Init-time, call-once parameter prep (hoisted out of the forward path).
    w2_p, b2_p = prepare_fc2_params(w2, b2)
    jax.block_until_ready((w2_p, b2_p))

    out, act = simple_nn_forward(x, w1, b1, w2_p, b2_p, out_size=output_size)
    jax.block_until_ready((out, act))

    # Reference check in plain JAX (mirrors the PyTorch module exactly).
    h_ref = jnp.maximum(x @ w1 + b1, 0.0)
    act_ref = ((h_ref - h_ref.min()) / (h_ref.max() - h_ref.min())).reshape(1, -1)
    out_ref = h_ref @ w2 + b2
    assert out.shape == (batch, output_size)
    assert act.shape == (1, batch * HIDDEN)
    assert jnp.allclose(out, out_ref, atol=1e-5, rtol=1e-5)
    assert jnp.allclose(act, act_ref, atol=1e-5, rtol=1e-5)

    print("KERNEL_OK")
</pallas_src>

<mosaic_0001>
module attributes {stable_mosaic.version = 11 : i64} {
  func.func @simple_nn_kernel(%arg0: memref<2x32xf32, #tpu.memory_space<vmem>>, %arg1: memref<32x128xf32, #tpu.memory_space<vmem>>, %arg2: memref<1x128xf32, #tpu.memory_space<vmem>>, %arg3: memref<128x128xf32, #tpu.memory_space<vmem>>, %arg4: memref<1x128xf32, #tpu.memory_space<vmem>>, %arg5: memref<2x128xf32, #tpu.memory_space<vmem>>, %arg6: memref<2x128xf32, #tpu.memory_space<vmem>>) attributes {dimension_semantics = [], scalar_prefetch = 0 : i64, scratch_operands = 0 : i64, tpu.core_type = #tpu.core_type<tc>} {
    %c0 = arith.constant 0 : index
    %c0_0 = arith.constant 0 : index
    %0 = vector.load %arg0[%c0, %c0_0] : memref<2x32xf32, #tpu.memory_space<vmem>>, vector<2x32xf32>
    %c0_1 = arith.constant 0 : index
    %c0_2 = arith.constant 0 : index
    %1 = vector.load %arg1[%c0_1, %c0_2] : memref<32x128xf32, #tpu.memory_space<vmem>>, vector<32x128xf32>
    %cst = arith.constant dense<0.000000e+00> : vector<2x128xf32>
    %2 = tpu.matmul %0, %1, %cst {dimension_numbers = #tpu.dot_dimension_numbers<[1], [0], [0], [1], [0, 0, 1, 1], [], []>} : vector<2x32xf32>, vector<32x128xf32>, vector<2x128xf32> -> vector<2x128xf32>
    %c0_3 = arith.constant 0 : index
    %c0_4 = arith.constant 0 : index
    %3 = vector.load %arg2[%c0_3, %c0_4] : memref<1x128xf32, #tpu.memory_space<vmem>>, vector<1x128xf32>
    %4 = vector.broadcast %3 : vector<1x128xf32> to vector<2x128xf32>
    %5 = arith.addf %2, %4 : vector<2x128xf32>
    %cst_5 = arith.constant 0.000000e+00 : f32
    %6 = vector.broadcast %cst_5 : f32 to vector<2x128xf32>
    %7 = arith.maximumf %5, %6 : vector<2x128xf32>
    %8 = vector.shape_cast %7 : vector<2x128xf32> to vector<1x2x128xf32>
    %cst_6 = arith.constant dense<0x7F800000> : vector<1xf32>
    %9 = vector.multi_reduction <minimumf>, %8, %cst_6 [1, 2] : vector<1x2x128xf32> to vector<1xf32>
    %10 = vector.shape_cast %9 : vector<1xf32> to vector<1x1x1xf32>
    %11 = vector.extract %10[0, 0, 0] : f32 from vector<1x1x1xf32>
    %12 = vector.broadcast %11 : f32 to vector<1x1xf32>
    %13 = vector.shape_cast %7 : vector<2x128xf32> to vector<1x2x128xf32>
    %cst_7 = arith.constant dense<0xFF800000> : vector<1xf32>
    %14 = vector.multi_reduction <maximumf>, %13, %cst_7 [1, 2] : vector<1x2x128xf32> to vector<1xf32>
    %15 = vector.shape_cast %14 : vector<1xf32> to vector<1x1x1xf32>
    %16 = vector.extract %15[0, 0, 0] : f32 from vector<1x1x1xf32>
    %17 = vector.broadcast %16 : f32 to vector<1x1xf32>
    %18 = arith.subf %17, %12 : vector<1x1xf32>
    %19 = tpu.reciprocal %18 : vector<1x1xf32> -> vector<1x1xf32>
    %20 = vector.broadcast %12 : vector<1x1xf32> to vector<2x128xf32>
    %21 = arith.subf %7, %20 : vector<2x128xf32>
    %22 = vector.broadcast %19 : vector<1x1xf32> to vector<2x128xf32>
    %23 = arith.mulf %21, %22 : vector<2x128xf32>
    %c0_8 = arith.constant 0 : index
    %c0_9 = arith.constant 0 : index
    %24 = vector.load %arg6[%c0_8, %c0_9] : memref<2x128xf32, #tpu.memory_space<vmem>>, vector<2x128xf32>
    tpu.vector_store %arg6[%c0_8, %c0_9], %23 {strides = array<i32>} : memref<2x128xf32, #tpu.memory_space<vmem>>, vector<2x128xf32>,
    %c0_10 = arith.constant 0 : index
    %c0_11 = arith.constant 0 : index
    %25 = vector.load %arg3[%c0_10, %c0_11] : memref<128x128xf32, #tpu.memory_space<vmem>>, vector<128x128xf32>
    %cst_12 = arith.constant dense<0.000000e+00> : vector<2x128xf32>
    %26 = tpu.matmul %7, %25, %cst_12 {dimension_numbers = #tpu.dot_dimension_numbers<[1], [0], [0], [1], [0, 0, 1, 1], [], []>} : vector<2x128xf32>, vector<128x128xf32>, vector<2x128xf32> -> vector<2x128xf32>
    %c0_13 = arith.constant 0 : index
    %c0_14 = arith.constant 0 : index
    %27 = vector.load %arg4[%c0_13, %c0_14] : memref<1x128xf32, #tpu.memory_space<vmem>>, vector<1x128xf32>
    %28 = vector.broadcast %27 : vector<1x128xf32> to vector<2x128xf32>
    %29 = arith.addf %26, %28 : vector<2x128xf32>
    %c0_15 = arith.constant 0 : index
    %c0_16 = arith.constant 0 : index
    %30 = vector.load %arg5[%c0_15, %c0_16] : memref<2x128xf32, #tpu.memory_space<vmem>>, vector<2x128xf32>
    tpu.vector_store %arg5[%c0_15, %c0_16], %29 {strides = array<i32>} : memref<2x128xf32, #tpu.memory_space<vmem>>, vector<2x128xf32>,
    return
  }
}

</mosaic_0001>

<bundles_post_ra>
// kernel: simple_nn_forward.1
= control target key start
LH: loop header
LB: loop body
LE: loop exit
PB: predicated region body
PF: predicated region fallthrough
CT: control target
= control target key end

     0   :  { %12 = vsyncpa [#allocation3], 0  ;;  %s654_s0 = inlined_call_operand.hbm [shape: f32[2,32], index: 0, kind: input, shape index: {}]   ;;  %s655_s1 = inlined_call_operand.hbm [shape: f32[32,128], index: 1, kind: input, shape index: {}]   ;;  %s656_s2 = inlined_call_operand.vmem [shape: f32[1,128], index: 2, kind: input, shape index: {}]   ;;  %s657_s3 = inlined_call_operand.hbm [shape: f32[128,128], index: 3, kind: input, shape index: {}]   ;;  %s658_s4 = inlined_call_operand.vmem [shape: f32[1,128], index: 4, kind: input, shape index: {}]   ;;  %s659_s5 = inlined_call_operand.hbm [shape: f32[2,128], index: 5, kind: output, shape index: {0}]   ;;  %s660_s6 = inlined_call_operand.hbm [shape: f32[2,128], index: 6, kind: output, shape index: {1}]  }
   0x1   :  { %13 = vsyncpa [#allocation6], 0 }
   0x2   :  { %14 = vsyncpa [#allocation4], 0 }
   0x3   :  { %15 = vsyncpa [#allocation10], 0  ;;  %s537_s21 = smov [#allocation5]   ;;  %s419_s25 = scalar_lea.hbm %s655_s1, 512 }
   0x4   :  { %s31_s22 = sshll.u32 %s537_s21, 4  ;;  %p420_p0 = scmp.ne.s32.totalorder %s655_s1, %s419_s25  ;;  %s32_s22 = int_to_ptr.vmem [resolvable:$true] %s31_s22 }
   0x5   :  { %p423_p1 = scmp.lt.u32.totalorder %s419_s25, %s655_s1 }
   0x7   :  { %p425_p2 = pnand %p423_p1, %p420_p0 }
   0x9   :  { %428 = shalt.err (!%p425_p2)
}
   0xa   :  { %s429_s30 = scalar_lea.vmem %s32_s22, 512  ;;  %p434_p4 = scmp.lt.s32.totalorder %s32_s22, %s32_s22 }
   0xb   :  { %p430_p3 = scmp.ne.s32.totalorder %s32_s22, %s429_s30  ;;  %p435_p5 = scmp.lt.s32.totalorder %s429_s30, %s429_s30 }
   0xd   :  { %p436_p6 = por %p435_p5, %p434_p4 }
   0xf   :  { %p437_p7 = pnand %p436_p6, %p430_p3 }
  0x11   :  { %440 = shalt.err (!%p437_p7)
}
  0x12   :  { %s538_s7 = smov 128   ;;  %s539_s8 = smov 8  }
  0x13   :  { %37 = dma.hbm_to_vmem [thread:$0]  %s655_s1, 512, %s32_s22, [#allocation6], %s538_s7, %s538_s7, %s539_s8  }
  0x14   :  { %s540_s11 = smov [#allocation2]   ;;  %s541_s13 = smov [#allocation7]  }
  0x15   :  { %s22_s12 = sshll.u32 %s540_s11, 4  ;;  %s45_s14 = sshll.u32 %s541_s13, 4  ;;  %s23_s12 = int_to_ptr.vmem [resolvable:$true] %s22_s12  ;;  %s46_s14 = int_to_ptr.vmem [resolvable:$true] %s45_s14 }
  0x16   :  { %s441_s17 = scalar_lea.hbm %s654_s0, 32 }
  0x17   :  { %p442_p8 = scmp.ne.s32.totalorder %s654_s0, %s441_s17  ;;  %p445_p9 = scmp.lt.u32.totalorder %s441_s17, %s654_s0 }
  0x19   :  { %p447_p10 = pnand %p445_p9, %p442_p8 }
  0x1b   :  { %450 = shalt.err (!%p447_p10)
}
  0x1c   :  { %s451_s1 = scalar_lea.vmem %s23_s12, 32  ;;  %p456_p12 = scmp.lt.s32.totalorder %s23_s12, %s23_s12 }
  0x1d   :  { %p452_p11 = scmp.ne.s32.totalorder %s23_s12, %s451_s1  ;;  %p457_p13 = scmp.lt.s32.totalorder %s451_s1, %s451_s1 }
  0x1f   :  { %p458_p0 = por %p457_p13, %p456_p12 }
  0x21   :  { %p459_p1 = pnand %p458_p0, %p452_p11 }
  0x23   :  { %462 = shalt.err (!%p459_p1)
}
  0x24   :  { %25 = dma.hbm_to_vmem [thread:$0]  %s654_s0, 32, %s23_s12, [#allocation3]  }
  0x25   :  { %s463_s26 = scalar_lea.hbm %s657_s3, 2048 }
  0x26   :  { %p464_p2 = scmp.ne.s32.totalorder %s657_s3, %s463_s26  ;;  %p467_p3 = scmp.lt.u32.totalorder %s463_s26, %s657_s3 }
  0x28   :  { %p469_p4 = pnand %p467_p3, %p464_p2 }
  0x2a   :  { %472 = shalt.err (!%p469_p4)
}
  0x2b   :  { %s473_s9 = scalar_lea.vmem %s46_s14, 2048  ;;  %p478_p6 = scmp.lt.s32.totalorder %s46_s14, %s46_s14 }
  0x2c   :  { %p474_p5 = scmp.ne.s32.totalorder %s46_s14, %s473_s9  ;;  %p479_p7 = scmp.lt.s32.totalorder %s473_s9, %s473_s9 }
  0x2e   :  { %p480_p8 = por %p479_p7, %p478_p6 }
  0x30   :  { %p481_p9 = pnand %p480_p8, %p474_p5 }
  0x32   :  { %484 = shalt.err (!%p481_p9)
}
  0x33   :  { %51 = dma.hbm_to_vmem [thread:$0]  %s657_s3, 2048, %s46_s14, [#allocation6], %s538_s7, %s538_s7, %s539_s8  }
  0x34   :  { %529 = dma.done.wait [#allocation3], 32  }
  0x35   :  { %530 = vsyncadd [#allocation3], 4294967264 }
  0x36   :  { %531 = dma.done.wait [#allocation6], 2560  }
  0x37   :  { %532 = vsyncadd [#allocation6], 4294964736  ;;  %v542_v0 = vmov 0.0|0.0   ;;  %vm543_vm0 = vmmov 0   ;;  %v544_v1 = vmov 0.0   ;;  %v64_v2 = vld [vmem:[#allocation5] sm:$0xff] }
  0x38   :  { %373 = vmatprep.subr.bf16.mxu0 %v542_v0  ;;  %335 = vmatprep.mubr.msk.f32.mxu0 %vm543_vm0, %v544_v1  ;;  %v65_v3 = vld [vmem:[#allocation5 + $0x8] sm:$0xff]  ;;  %v66_v4 = vld [vmem:[#allocation5 + $0x10] sm:$0xff]  ;;  %v67_v6 = vld [vmem:[#allocation5 + $0x18] sm:$0xff]  ;;  %vm75_vm1 = vcmask 261120   ;;  %vm150_vm2 = vcmask 1041408   ;;  %s545_s13 = smov [#allocation8]  }
  0x39   :  { %379 = vmatprep.subr.bf16.mxu1 %v542_v0  ;;  %370 = vmatprep.mubr.msk.f32.mxu1 %vm543_vm0, %v544_v1  ;;  %v374_v5 = vpack.c.bf16 %v65_v3, %v64_v2  ;;  %v178_v7 = vld [vmem:[#allocation7] sm:$0xff]  ;;  %v179_v8 = vld [vmem:[#allocation7 + $0x8] sm:$0xff]  ;;  %v180_v9 = vld [vmem:[#allocation7 + $0x10] sm:$0xff]  ;;  %v377_v11 = vpack.c.bf16 %v67_v6, %v66_v4  ;;  %s278_s14 = sshll.u32 %s545_s13, 4  ;;  %s279_s14 = int_to_ptr.vmem [resolvable:$true] %s278_s14 }
  0x3a   :  { %v181_v10 = vld [vmem:[#allocation7 + $0x18] sm:$0xff]  ;;  %v380_v12 = vpack.c.bf16 %v179_v8, %v178_v7  ;;  %v182_v14 = vld [vmem:[#allocation7 + $0x20] sm:$0xff]  ;;  %v183_v15 = vld [vmem:[#allocation7 + $0x28] sm:$0xff]  ;;  %s485_s15 = scalar_lea.vmem %s279_s14, 32  ;;  %p490_p11 = scmp.lt.s32.totalorder %s279_s14, %s279_s14 }
  0x3b   :  { %375 = vmatpush3.bf16.msra.mxu0 %v374_v5  ;;  %v383_v13 = vpack.c.bf16 %v181_v10, %v180_v9  ;;  %v63_v16 = vld [vmem:[#allocation2] sm:$0x3]  ;;  %v386_v17 = vpack.c.bf16 %v183_v15, %v182_v14  ;;  %v184_v18 = vld [vmem:[#allocation7 + $0x30] sm:$0xff]  ;;  %v186_v21 = vld [vmem:[#allocation7 + $0x40] sm:$0xff]  ;;  %p486_p10 = scmp.ne.s32.totalorder %s279_s14, %s485_s15  ;;  %p491_p12 = scmp.lt.s32.totalorder %s485_s15, %s485_s15 }
  0x3c   :  { %376 = vmatprep.subr.bf16.mxu0 %v542_v0  ;;  %381 = vmatpush3.bf16.msra.mxu1 %v380_v12  ;;  %v185_v19 = vld [vmem:[#allocation7 + $0x38] sm:$0xff]  ;;  %v187_v22 = vld [vmem:[#allocation7 + $0x48] sm:$0xff]  ;;  %v188_v24 = vld [vmem:[#allocation7 + $0x50] sm:$0xff] }
  0x3d   :  { %382 = vmatprep.subr.bf16.mxu1 %v542_v0  ;;  %v389_v20 = vpack.c.bf16 %v185_v19, %v184_v18  ;;  %v392_v23 = vpack.c.bf16 %v187_v22, %v186_v21  ;;  %v189_v25 = vld [vmem:[#allocation7 + $0x58] sm:$0xff]  ;;  %v190_v27 = vld [vmem:[#allocation7 + $0x60] sm:$0xff]  ;;  %v191_v28 = vld [vmem:[#allocation7 + $0x68] sm:$0xff]  ;;  %p492_p13 = por %p491_p12, %p490_p11 }
  0x3e   :  { %v395_v26 = vpack.c.bf16 %v189_v25, %v188_v24  ;;  %v398_v29 = vpack.c.bf16 %v191_v28, %v190_v27  ;;  %v192_v30 = vld [vmem:[#allocation7 + $0x70] sm:$0xff]  ;;  %v193_v31 = vld [vmem:[#allocation7 + $0x78] sm:$0xff] }
  0x3f   :  { %378 = vmatpush3.bf16.msra.mxu0 %v377_v11  ;;  %v401_v32 = vpack.c.bf16 %v193_v31, %v192_v30  ;;  %v302_v33 = vld [vmem:[%s656_s2] ss:$0 sm:$0xff]  ;;  %p493_p0 = pnand %p492_p13, %p486_p10 }
  0x40   :  { %384 = vmatpush3.bf16.msra.mxu1 %v383_v13  ;;  %v304_v56 = vld [vmem:[%s658_s4] ss:$0 sm:$0xff] }
  0x41   :  { %385 = vmatprep.subr.bf16.mxu1 %v542_v0 }
  0x42   :  { %336 = vmatmul.mubr.msk.f32.vlgmr.msra.gmra.mrb[0].mxu0 %vm75_vm1, %v63_v16 }
  0x44   :  { %387 = vmatpush3.bf16.msra.mxu1 %v386_v17 }
  0x45   :  { %388 = vmatprep.subr.bf16.mxu1 %v542_v0 }
  0x48   :  { %390 = vmatpush3.bf16.msra.mxu1 %v389_v20 }
  0x49   :  { %391 = vmatprep.subr.bf16.mxu1 %v542_v0 }
  0x4c   :  { %393 = vmatpush3.bf16.msra.mxu1 %v392_v23 }
  0x4d   :  { %394 = vmatprep.subr.bf16.mxu1 %v542_v0 }
  0x50   :  { %396 = vmatpush3.bf16.msra.mxu1 %v395_v26 }
  0x51   :  { %397 = vmatprep.subr.bf16.mxu1 %v542_v0 }
  0x54   :  { %399 = vmatpush3.bf16.msra.mxu1 %v398_v29 }
  0x55   :  { %400 = vmatprep.subr.bf16.mxu1 %v542_v0 }
  0x58   :  { %402 = vmatpush3.bf16.msra.mxu1 %v401_v32 }
 0x115   :  { %v145_v34 = vpop.f32.mrb[0].mxu0 }
 0x116   :  { %v146_v35 = vadd.f32 %v302_v33, %v145_v34  ;;  %v337_v36 = vpop.f32.mrb[1].mxu0 }
 0x118   :  { %v149_v37 = vmax.f32 %v146_v35, 0.0 }
 0x11a   :  { %371 = vmatmul.mubr.f32.vlgmr.msra.gmra.mrb[0].mxu1 %v149_v37  ;;  %v151_v38 = vsel %vm150_vm2, %v149_v37, inf  ;;  %v162_v39 = vsel %vm150_vm2, %v149_v37, -inf }
 0x11b   :  { %152 = vmin.xlane.f32.xlu0 %v151_v38 }
 0x11f   :  { %163 = vmax.xlane.f32.xlu0 %v162_v39 }
 0x1a8   :  { %v153_v40 = vpop.xlane.xlu0 %152 }
 0x1a9   :  { %v154_v41 = vrot.slane %v153_v40, 4 }
 0x1ab   :  { %v155_v42 = vmin.f32 %v153_v40, %v154_v41 }
 0x1ac   :  { %v164_v43 = vpop.xlane.xlu0 %163 }
 0x1ad   :  { %v156_v44 = vrot.slane %v155_v42, 2  ;;  %v165_v45 = vrot.slane %v164_v43, 4 }
 0x1af   :  { %v166_v46 = vmax.f32 %v164_v43, %v165_v45  ;;  %v157_v47 = vmin.f32 %v155_v42, %v156_v44 }
 0x1b1   :  { %v167_v48 = vrot.slane %v166_v46, 2  ;;  %v158_v49 = vrot.slane %v157_v47, 1 }
 0x1b3   :  { %v168_v50 = vmax.f32 %v166_v46, %v167_v48  ;;  %v159_v51 = vmin.f32 %v157_v47, %v158_v49 }
 0x1b5   :  { %403 = vpush %v159_v51  ;;  %v169_v52 = vrot.slane %v168_v50, 1 }
 0x1b7   :  { %v170_v53 = vmax.f32 %v168_v50, %v169_v52 }
 0x1b9   :  { %405 = vpush %v170_v53 }
 0x1e6   :  { %s404_s2 = spop %403 }
 0x1e7   :  { %v161_v54 = vstv %s404_s2 }
 0x1ea   :  { %s406_s8 = spop %405 }
 0x1eb   :  { %v172_v55 = vstv %s406_s8 }
 0x1ec   :  { %v173_v57 = vsub.f32 %v172_v55, %v161_v54 }
 0x1ed   :  { %v267_v58 = vpop.f32.mrb[0].mxu1 }
 0x1ee   :  { %417 = vrcp.f32 %v173_v57  ;;  %v268_v59 = vadd.f32 %v304_v56, %v267_v58  ;;  %v372_v60 = vpop.f32.mrb[1].mxu1 }
 0x1f0   :  { %271 = vst [vmem:[#allocation8] sm:$0x3] %v268_v59 }
 0x1f1   :  { %496 = shalt.err (!%p493_p0)
}
 0x1f2   :  { %s497_s4 = scalar_lea.hbm %s659_s5, 32 }
 0x1f3   :  { %p498_p1 = scmp.ne.s32.totalorder %s659_s5, %s497_s4  ;;  %p501_p2 = scmp.lt.u32.totalorder %s497_s4, %s659_s5 }
 0x1f5   :  { %p503_p3 = pnand %p501_p2, %p498_p1 }
 0x1f7   :  { %506 = shalt.err (!%p503_p3)
}
 0x1f8   :  { %281 = dma.vmem_to_hbm [thread:$0]  %s279_s14, 32, %s659_s5, [#allocation4]   ;;  %v175_v61 = vsub.f32 %v149_v37, %v161_v54  ;;  %v418_v62 = vpop.eup %417 }
 0x1f9   :  { %s546_s23 = smov [#allocation9]  }
 0x1fa   :  { %s288_s24 = sshll.u32 %s546_s23, 4  ;;  %v176_v63 = vmul.f32 %v418_v62, %v175_v61  ;;  %s289_s24 = int_to_ptr.vmem [resolvable:$true] %s288_s24 }
 0x1fb   :  { %s507_s25 = scalar_lea.vmem %s289_s24, 32  ;;  %p512_p5 = scmp.lt.s32.totalorder %s289_s24, %s289_s24 }
 0x1fc   :  { %177 = vst [vmem:[#allocation9] sm:$0x3] %v176_v63  ;;  %p508_p4 = scmp.ne.s32.totalorder %s289_s24, %s507_s25  ;;  %p513_p6 = scmp.lt.s32.totalorder %s507_s25, %s507_s25 }
 0x1fe   :  { %p514_p7 = por %p513_p6, %p512_p5 }
 0x200   :  { %p515_p8 = pnand %p514_p7, %p508_p4 }
 0x202   :  { %518 = shalt.err (!%p515_p8)
}
 0x203   :  { %s519_s28 = scalar_lea.hbm %s660_s6, 32 }
 0x204   :  { %p520_p9 = scmp.ne.s32.totalorder %s660_s6, %s519_s28  ;;  %p523_p10 = scmp.lt.u32.totalorder %s519_s28, %s660_s6 }
 0x206   :  { %p525_p11 = pnand %p523_p10, %p520_p9 }
 0x208   :  { %528 = shalt.err (!%p525_p11)
}
 0x209   :  { %291 = dma.vmem_to_hbm [thread:$0]  %s289_s24, 32, %s660_s6, [#allocation10]  }
 0x20a   :  { %533 = dma.done.wait [#allocation4], 32  }
 0x20b   :  { %534 = vsyncadd [#allocation4], 4294967264 }
 0x20c   :  { %535 = dma.done.wait [#allocation10], 32  }
 0x20d   :  { %536 = vsyncadd [#allocation10], 4294967264 }
 0x20e   :  { %298 = vsyncpa [#allocation3], 1 }
 0x20f   :  { %299 = vsyncpa [#allocation6], 1 }
 0x210   :  { %300 = vsyncpa [#allocation4], 1 }
 0x211   :  { %301 = vsyncpa [#allocation10], 1 }

</bundles_post_ra>
